<compile_context>
chip_gen: v6e
topology: v6e:2x2x1
jax: 0.10.0
libtpu: 0.0.40
codegen_flags: <defaults>
</compile_context>

<pallas_src>
import functools
import math

import jax
import jax.numpy as jnp
from jax.experimental import pallas as pl
from jax.experimental.pallas import tpu as pltpu


# ------------------------------ in-kernel helpers ------------------------------

def _erf(x):
    # Abramowitz & Stegun 7.1.26 polynomial (max abs err ~1.5e-7) -- exact-GELU semantics
    # to f32 precision using only exp/mul/add (guaranteed Mosaic lowering).
    a1, a2, a3, a4, a5 = 0.254829592, -0.284496736, 1.421413741, -1.453152027, 1.061405429
    p = 0.3275911
    s = jnp.sign(x)
    ax = jnp.abs(x)
    t = 1.0 / (1.0 + p * ax)
    y = 1.0 - ((((a5 * t + a4) * t + a3) * t + a2) * t + a1) * t * jnp.exp(-ax * ax)
    return s * y


def _gelu_exact(x):
    # matches torch.nn.GELU() (erf-based) default
    return 0.5 * x * (1.0 + _erf(x * (1.0 / math.sqrt(2.0))))


def _layer_norm(x, w, b, eps=1e-5):
    mean = jnp.mean(x, axis=-1, keepdims=True)
    var = jnp.mean((x - mean) ** 2, axis=-1, keepdims=True)
    return (x - mean) * jax.lax.rsqrt(var + eps) * w + b


# ------------------------------ Pallas kernels ------------------------------

def _patch_embed_kernel(p_ref, w_ref, b_ref, o_ref):
    # p_ref: (B*N, C*p*p) patches f32; w_ref: (C*p*p, D) bf16; b_ref: (1, D) f32
    o_ref[...] = (jnp.dot(p_ref[...].astype(jnp.bfloat16), w_ref[...],
                          preferred_element_type=jnp.float32)
                  + b_ref[...]).astype(o_ref.dtype)


def _layers_head_kernel(x_ref,
                        ln1w_ref, ln1b_ref, wq_ref, wk_ref, wv_ref,
                        bq_ref, bk_ref, bv_ref, wo_ref, bo_ref,
                        ln2w_ref, ln2b_ref, w1_ref, b1_ref, w2_ref, b2_ref,
                        hw_ref, hb_ref,
                        logits_ref, carry_ref, *, heads, n_tokens):
    # grid = (depth,) ; per-layer weights are (1, ...) slices of stacked (depth, ...) arrays.
    layer = pl.program_id(0)
    n_layers = pl.num_programs(0)
    B, Np, D = carry_ref.shape
    dh = D // heads
    G = heads * B
    M = B * Np
    scale = 1.0 / math.sqrt(dh)

    @pl.when(layer == 0)
    def _():
        carry_ref[...] = x_ref[...].astype(jnp.float32)

    # batch folded into the row axis (sublane-tile-aligned merge: Np % 8 == 0)
    x = carry_ref[...].reshape(M, D)                                   # (B*Np, D) f32

    # mask for zero-padded key tokens (token index >= n_tokens)
    key_mask = jax.lax.broadcasted_iota(jnp.int32, (1, Np), 1) < n_tokens

    # --- attention sub-block: x = out_proj(MHA(prenorm(x))) + x ---
    h = _layer_norm(x, ln1w_ref[0], ln1b_ref[0]).astype(jnp.bfloat16)  # (M, D)
    hb = jnp.broadcast_to(h[None], (heads, M, D))                      # batch heads on the MXU
    q = (jnp.einsum('hnd,hdk->hnk', hb, wq_ref[0],
                    preferred_element_type=jnp.float32) + bq_ref[0]) * scale
    k = jnp.einsum('hnd,hdk->hnk', hb, wk_ref[0],
                   preferred_element_type=jnp.float32) + bk_ref[0]
    v = jnp.einsum('hnd,hdk->hnk', hb, wv_ref[0],
                   preferred_element_type=jnp.float32) + bv_ref[0]
    # fold batch into the head-batched axis: (heads, B*Np, dh) -> (heads*B, Np, dh)
    qg = q.reshape(G, Np, dh).astype(jnp.bfloat16)
    kg = k.reshape(G, Np, dh).astype(jnp.bfloat16)
    vg = v.reshape(G, Np, dh).astype(jnp.bfloat16)
    s = jnp.einsum('gqd,gkd->gqk', qg, kg,
                   preferred_element_type=jnp.float32)                 # (G, Np, Np)
    s = jnp.where(key_mask, s, -1e30)
    s = s - jnp.max(s, axis=-1, keepdims=True)
    p = jnp.exp(s)
    p = p * pl.reciprocal(jnp.sum(p, axis=-1, keepdims=True), approx=True)
    ctx = jnp.einsum('gqk,gkd->gqd', p.astype(jnp.bfloat16), vg,
                     preferred_element_type=jnp.float32)               # (G, Np, dh)
    ctxh = ctx.reshape(heads, M, dh).astype(jnp.bfloat16)
    proj = jnp.einsum('hnk,hkd->hnd', ctxh, wo_ref[0],
                      preferred_element_type=jnp.float32)              # (heads, M, D)
    x = x + jnp.sum(proj, axis=0) + bo_ref[0]                          # sum over heads == concat @ Wo

    # --- FFN sub-block: x = W2 * gelu(W1 * postnorm(x) + b1) + b2 + x ---
    h2 = _layer_norm(x, ln2w_ref[0], ln2b_ref[0]).astype(jnp.bfloat16)
    f = jnp.dot(h2, w1_ref[0], preferred_element_type=jnp.float32) + b1_ref[0]
    f = _gelu_exact(f).astype(jnp.bfloat16)
    f = jnp.dot(f, w2_ref[0], preferred_element_type=jnp.float32) + b2_ref[0]
    x = x + f

    carry_ref[...] = x.reshape(B, Np, D)

    # --- fused classification head: logits = CLS @ Wh + bh (written once, lane-dense 128) ---
    @pl.when(layer == n_layers - 1)
    def _():
        cls = x.reshape(B, Np, D)[:, 0, :].astype(jnp.bfloat16)        # (B, D)
        logits_ref[...] = (jnp.dot(cls, hw_ref[...],
                                   preferred_element_type=jnp.float32)
                           + hb_ref[...]).astype(logits_ref.dtype)


# ------------------------------ wrappers ------------------------------

def patch_embed(patches, w, b):
    """patches: (B*N, C*p*p) -> (B*N, D). One matmul, full blocks."""
    M, K = patches.shape
    D = w.shape[1]
    return pl.pallas_call(
        _patch_embed_kernel,
        out_shape=jax.ShapeDtypeStruct((M, D), jnp.float32),
        grid=(1,),
        in_specs=[
            pl.BlockSpec((M, K), lambda i: (0, 0)),
            pl.BlockSpec((K, D), lambda i: (0, 0)),
            pl.BlockSpec((1, D), lambda i: (0, 0)),
        ],
        out_specs=pl.BlockSpec((M, D), lambda i: (0, 0)),
    )(patches, w, b)


def transformer_layers_and_head(x, layer_params, head_w, head_b, *, heads, n_tokens):
    """All transformer layers + head in one pallas_call: grid=(depth,), weights stacked on depth."""
    B, Np, D = x.shape
    names = ("ln1_w", "ln1_b", "wq", "wk", "wv", "bq", "bk", "bv",
             "wo", "bo", "ln2_w", "ln2_b", "w1", "b1", "w2", "b2")
    weights = [layer_params[n] for n in names]
    depth = weights[0].shape[0]
    O = head_w.shape[1]

    in_specs = [pl.BlockSpec((B, Np, D), lambda l: (0, 0, 0))]          # carried input, fetched once
    for a in weights:
        in_specs.append(
            pl.BlockSpec((1,) + a.shape[1:], lambda l, n=a.ndim: (l,) + (0,) * (n - 1)))
    in_specs.append(pl.BlockSpec(head_w.shape, lambda l: (0, 0)))       # head weights, fetched once
    in_specs.append(pl.BlockSpec(head_b.shape, lambda l: (0, 0)))

    # advisory cost hint so XLA schedules surrounding HBM traffic around the long custom call
    flops = int(depth * B * (24 * Np * D * D + 4 * Np * Np * D) + 2 * B * D * O)
    transc = int(depth * B * (heads * Np * Np + 4 * Np * D))
    bytes_acc = int(sum(int(a.size) * a.dtype.itemsize for a in weights)
                    + int(x.size) * x.dtype.itemsize
                    + int(head_w.size) * head_w.dtype.itemsize
                    + int(head_b.size) * head_b.dtype.itemsize
                    + B * O * 4)

    kernel = functools.partial(_layers_head_kernel, heads=heads, n_tokens=n_tokens)
    return pl.pallas_call(
        kernel,
        out_shape=jax.ShapeDtypeStruct((B, O), jnp.float32),
        grid=(depth,),
        in_specs=in_specs,
        out_specs=pl.BlockSpec((B, O), lambda l: (0, 0)),
        scratch_shapes=[pltpu.VMEM((B, Np, D), jnp.float32)],           # activation carry (never hits HBM)
        compiler_params=pltpu.CompilerParams(
            dimension_semantics=("arbitrary",),                          # sequential carry over depth
            vmem_limit_bytes=64 * 1024 * 1024),
        cost_estimate=pl.CostEstimate(flops=flops, transcendentals=transc,
                                      bytes_accessed=bytes_acc),
    )(x, *weights, head_w, head_b)


def vit_forward(x, params, *, patch, heads, num_classes=10):
    """x: (B, 3, H, W) float32 NCHW."""
    B, C, H, W = x.shape
    Hp, Wp = H // patch, W // patch
    N = Hp * Wp
    D = params["patch_w"].shape[1]
    n_tokens = N + 1
    Np = ((n_tokens + 7) // 8) * 8          # sublane-aligned token count (padding masked in-kernel)

    # Conv2d(3, D, patch, stride=patch) == per-patch linear projection; flatten patches in
    # (c, kh, kw) order to match the flattened conv weight layout.
    patches = x.reshape(B, C, Hp, patch, Wp, patch)
    patches = patches.transpose(0, 2, 4, 1, 3, 5).reshape(B * N, C * patch * patch)
    tokens = patch_embed(patches, params["patch_w"], params["patch_b"]).reshape(B, N, D)

    # prepend CLS token and add learned positional embedding (wpe), then zero-pad tokens
    cls = jnp.broadcast_to(params["cls"], (B, 1, D))
    tokens = jnp.concatenate([cls, tokens], axis=1) + params["wpe"][None]    # (B, N+1, D)
    tokens = jnp.pad(tokens, ((0, 0), (0, Np - n_tokens), (0, 0)))           # (B, Np, D)

    logits = transformer_layers_and_head(tokens, params["layers"],
                                         params["head_w"], params["head_b"],
                                         heads=heads, n_tokens=n_tokens)     # (B, 128)
    return logits[:, :num_classes]                                           # (B, 10)


# ------------------------------ parameter init ------------------------------

def init_params(key, *, dim, heads, depth, patch, size, in_ch=3, num_classes=10):
    assert dim % heads == 0
    dh = dim // heads
    n_tokens = (size // patch) ** 2 + 1

    def lin(k, fan_in, fan_out):
        kw, kb = jax.random.split(k)
        w = jax.random.normal(kw, (fan_in, fan_out), jnp.float32) * 0.02
        b = jax.random.normal(kb, (1, fan_out), jnp.float32) * 0.01
        return w, b

    keys = jax.random.split(key, 3 + depth)
    params = {}
    pw, pb = lin(keys[0], in_ch * patch * patch, dim)        # flattened conv weight/bias
    params["patch_w"], params["patch_b"] = pw.astype(jnp.bfloat16), pb
    params["cls"] = jax.random.normal(keys[1], (1, 1, dim), jnp.float32)
    params["wpe"] = jnp.zeros((n_tokens, dim), jnp.float32)  # matches torch.zeros init

    hw, hb = lin(keys[2], dim, num_classes)
    padded_classes = max(128, num_classes)                   # lane-dense head store
    params["head_w"] = (jnp.zeros((dim, padded_classes), jnp.float32)
                        .at[:, :num_classes].set(hw).astype(jnp.bfloat16))
    params["head_b"] = jnp.zeros((1, padded_classes), jnp.float32).at[:, :num_classes].set(hb)

    per_layer = {n: [] for n in ("ln1_w", "ln1_b", "wq", "wk", "wv", "bq", "bk", "bv",
                                 "wo", "bo", "ln2_w", "ln2_b", "w1", "b1", "w2", "b2")}
    for i in range(depth):
        k1, k2, k3, k4, k5, k6 = jax.random.split(keys[3 + i], 6)
        wq, bq = lin(k1, dim, dim)
        wk, bk = lin(k2, dim, dim)
        wv, bv = lin(k3, dim, dim)
        wo, bo = lin(k4, dim, dim)
        w1, b1 = lin(k5, dim, 4 * dim)
        w2, b2 = lin(k6, 4 * dim, dim)
        per_layer["ln1_w"].append(jnp.ones((1, dim), jnp.float32))
        per_layer["ln1_b"].append(jnp.zeros((1, dim), jnp.float32))
        per_layer["ln2_w"].append(jnp.ones((1, dim), jnp.float32))
        per_layer["ln2_b"].append(jnp.zeros((1, dim), jnp.float32))
        # head-major layouts (heads, D, dh) / (heads, dh, D): no per-head lane slicing in-kernel
        per_layer["wq"].append(wq.reshape(dim, heads, dh).transpose(1, 0, 2).astype(jnp.bfloat16))
        per_layer["wk"].append(wk.reshape(dim, heads, dh).transpose(1, 0, 2).astype(jnp.bfloat16))
        per_layer["wv"].append(wv.reshape(dim, heads, dh).transpose(1, 0, 2).astype(jnp.bfloat16))
        per_layer["bq"].append(bq.reshape(heads, 1, dh))
        per_layer["bk"].append(bk.reshape(heads, 1, dh))
        per_layer["bv"].append(bv.reshape(heads, 1, dh))
        per_layer["wo"].append(wo.reshape(heads, dh, dim).astype(jnp.bfloat16))
        per_layer["bo"].append(bo)
        per_layer["w1"].append(w1.astype(jnp.bfloat16))
        per_layer["b1"].append(b1)
        per_layer["w2"].append(w2.astype(jnp.bfloat16))
        per_layer["b2"].append(b2)
    params["layers"] = {n: jnp.stack(v, axis=0) for n, v in per_layer.items()}
    return params


# ------------------------------ pure-JAX reference (for a sanity check) ------------------------------

def vit_reference(x, params, *, patch, heads, num_classes=10):
    B, C, H, W = x.shape
    Hp, Wp = H // patch, W // patch
    N = Hp * Wp
    D = params["patch_w"].shape[1]
    dh = D // heads
    scale = 1.0 / math.sqrt(dh)

    def ln(u, w, b):
        m = u.mean(-1, keepdims=True)
        v2 = ((u - m) ** 2).mean(-1, keepdims=True)
        return (u - m) / jnp.sqrt(v2 + 1e-5) * w + b

    patches = x.reshape(B, C, Hp, patch, Wp, patch).transpose(0, 2, 4, 1, 3, 5).reshape(B, N, -1)
    t = patches @ params["patch_w"].astype(jnp.float32) + params["patch_b"]
    cls = jnp.broadcast_to(params["cls"], (B, 1, D))
    t = jnp.concatenate([cls, t], axis=1) + params["wpe"][None]

    L = params["layers"]
    depth = L["ln1_w"].shape[0]
    for l in range(depth):
        h = ln(t, L["ln1_w"][l], L["ln1_b"][l])
        q = jnp.einsum('bnd,hdk->bhnk', h, L["wq"][l].astype(jnp.float32)) + L["bq"][l][None]
        k = jnp.einsum('bnd,hdk->bhnk', h, L["wk"][l].astype(jnp.float32)) + L["bk"][l][None]
        v = jnp.einsum('bnd,hdk->bhnk', h, L["wv"][l].astype(jnp.float32)) + L["bv"][l][None]
        s = jnp.einsum('bhqd,bhkd->bhqk', q, k) * scale
        p = jax.nn.softmax(s, axis=-1)
        ctx = jnp.einsum('bhqk,bhkd->bhqd', p, v)
        proj = jnp.einsum('bhnk,hkd->bnd', ctx, L["wo"][l].astype(jnp.float32)) + L["bo"][l][None]
        t = t + proj
        h2 = ln(t, L["ln2_w"][l], L["ln2_b"][l])
        f = h2 @ L["w1"][l].astype(jnp.float32) + L["b1"][l]
        f = jax.nn.gelu(f, approximate=False)
        f = f @ L["w2"][l].astype(jnp.float32) + L["b2"][l]
        t = t + f

    logits = t[:, 0, :] @ params["head_w"].astype(jnp.float32) + params["head_b"]
    return logits[:, :num_classes]


# ------------------------------ main ------------------------------

if __name__ == "__main__":
    # small shapes consistent with the module: ViT(dim, patch, size) on NCHW input
    B, C, size, patch = 2, 3, 16, 4
    dim, heads, depth = 32, 4, 2   # scaled-down stand-in for dim=768, heads=12, depth=12

    key = jax.random.PRNGKey(0)
    kx, kp = jax.random.split(key)
    x = jax.random.normal(kx, (B, C, size, size), jnp.float32)
    params = init_params(kp, dim=dim, heads=heads, depth=depth, patch=patch, size=size)

    out = vit_forward(x, params, patch=patch, heads=heads)
    out = jax.block_until_ready(out)
    assert out.shape == (B, 10) and out.dtype == jnp.float32
    assert bool(jnp.all(jnp.isfinite(out)))

    # loose tolerance: kernel uses bf16 matmul operands + approx reciprocal, f32 accumulation
    ref = vit_reference(x, params, patch=patch, heads=heads)
    err = float(jnp.max(jnp.abs(out - ref)))
    assert err < 5e-2, f"max abs err vs reference: {err}"
    print("KERNEL_OK")
</pallas_src>

<mosaic_0001>
module attributes {stable_mosaic.version = 11 : i64} {
  func.func @_patch_embed_kernel(%arg0: i32, %arg1: memref<32x48xf32, #tpu.memory_space<vmem>>, %arg2: memref<48x32xbf16, #tpu.memory_space<vmem>>, %arg3: memref<1x32xf32, #tpu.memory_space<vmem>>, %arg4: memref<32x32xf32, #tpu.memory_space<vmem>>) attributes {dimension_semantics = [#tpu.dimension_semantics<arbitrary>], iteration_bounds = array<i64: 1>, scalar_prefetch = 0 : i64, scratch_operands = 0 : i64, tpu.core_type = #tpu.core_type<tc>, window_params = [{pipeline_mode = #tpu.pipeline_mode<synchronous>, transform_indices = @transform_0, window_bounds = array<i64: 32, 48>}, {pipeline_mode = #tpu.pipeline_mode<synchronous>, transform_indices = @transform_1, window_bounds = array<i64: 48, 32>}, {pipeline_mode = #tpu.pipeline_mode<synchronous>, transform_indices = @transform_2, window_bounds = array<i64: 1, 32>}, {pipeline_mode = #tpu.pipeline_mode<synchronous>, transform_indices = @transform_3, window_bounds = array<i64: 32, 32>}]} {
    %c0 = arith.constant 0 : index
    %c0_0 = arith.constant 0 : index
    %0 = vector.load %arg1[%c0, %c0_0] : memref<32x48xf32, #tpu.memory_space<vmem>>, vector<32x48xf32>
    %1 = arith.truncf %0 : vector<32x48xf32> to vector<32x48xbf16>
    %c0_1 = arith.constant 0 : index
    %c0_2 = arith.constant 0 : index
    %2 = vector.load %arg2[%c0_1, %c0_2] : memref<48x32xbf16, #tpu.memory_space<vmem>>, vector<48x32xbf16>
    %cst = arith.constant dense<0.000000e+00> : vector<32x32xf32>
    %3 = tpu.matmul %1, %2, %cst {dimension_numbers = #tpu.dot_dimension_numbers<[1], [0], [0], [1], [0, 0, 1, 1], [], []>} : vector<32x48xbf16>, vector<48x32xbf16>, vector<32x32xf32> -> vector<32x32xf32>
    %c0_3 = arith.constant 0 : index
    %c0_4 = arith.constant 0 : index
    %4 = vector.load %arg3[%c0_3, %c0_4] : memref<1x32xf32, #tpu.memory_space<vmem>>, vector<1x32xf32>
    %5 = vector.broadcast %4 : vector<1x32xf32> to vector<32x32xf32>
    %6 = arith.addf %3, %5 : vector<32x32xf32>
    %c0_5 = arith.constant 0 : index
    %c0_6 = arith.constant 0 : index
    %7 = vector.load %arg4[%c0_5, %c0_6] : memref<32x32xf32, #tpu.memory_space<vmem>>, vector<32x32xf32>
    tpu.vector_store %arg4[%c0_5, %c0_6], %6 {strides = array<i32>} : memref<32x32xf32, #tpu.memory_space<vmem>>, vector<32x32xf32>,
    return
  }
  func.func @transform_0(%arg0: i32) -> (i32, i32) {
    %c0_i32 = arith.constant 0 : i32
    %c0_i32_0 = arith.constant 0 : i32
    %c0_i32_1 = arith.constant 0 : i32
    return %c0_i32, %c0_i32_0 : i32, i32
  }
  func.func @transform_1(%arg0: i32) -> (i32, i32) {
    %c0_i32 = arith.constant 0 : i32
    %c0_i32_0 = arith.constant 0 : i32
    %c0_i32_1 = arith.constant 0 : i32
    return %c0_i32, %c0_i32_0 : i32, i32
  }
  func.func @transform_2(%arg0: i32) -> (i32, i32) {
    %c0_i32 = arith.constant 0 : i32
    %c0_i32_0 = arith.constant 0 : i32
    %c0_i32_1 = arith.constant 0 : i32
    return %c0_i32, %c0_i32_0 : i32, i32
  }
  func.func @transform_3(%arg0: i32) -> (i32, i32) {
    %c0_i32 = arith.constant 0 : i32
    %c0_i32_0 = arith.constant 0 : i32
    %c0_i32_1 = arith.constant 0 : i32
    return %c0_i32, %c0_i32_0 : i32, i32
  }
}

</mosaic_0001>

<bundles_post_ra>
// kernel: tpu_custom_call.1
= control target key start
LH: loop header
LB: loop body
LE: loop exit
PB: predicated region body
PF: predicated region fallthrough
CT: control target
= control target key end

     0   :  { %vm53_vm0 = vcmask 392192   ;;  %s229_s0 = inlined_call_operand.vmem [shape: f32[32,48], index: 0, kind: input, shape index: {}]   ;;  %s230_s1 = inlined_call_operand.vmem [shape: bf16[48,32], index: 1, kind: input, shape index: {}]   ;;  %s231_s2 = inlined_call_operand.vmem [shape: f32[1,32], index: 2, kind: input, shape index: {}]   ;;  %s232_s3 = inlined_call_operand.hbm [shape: f32[32,32], index: 3, kind: output, shape index: {}]  }
   0x1   :  { %v154_v0 = vld [vmem:[%s230_s1 + $0x10] sm:$0xff]   ;;  %v155_v1 = vld [vmem:[%s230_s1 + $0x8] sm:$0xff]   ;;  %v16_v2 = vld [vmem:[%s229_s0] sm:$0xff] }
   0x2   :  { %141 = vmatprep.subr.bf16.mxu0 %v154_v0  ;;  %v17_v3 = vld [vmem:[%s229_s0 + $0x8] sm:$0xff]  ;;  %v156_v4 = vld [vmem:[%s230_s1] sm:$0xff]  }
   0x3   :  { %142 = vmatpush3.bf16.msra.mxu0 %v154_v0  ;;  %v20_v5 = vpack.c.bf16 %v17_v3, %v16_v2 }
   0x4   :  { %143 = vmatprep.subr.bf16.mxu0 %v155_v1 }
   0x5   :  { %8 = vsyncpa [#allocation3], 0  ;;  %147 = vmatprep.mubr.msk.bf16.mxu0 %vm53_vm0, %v20_v5  ;;  %v18_v6 = vld [vmem:[%s229_s0 + $0x10] sm:$0xff]  ;;  %v19_v7 = vld [vmem:[%s229_s0 + $0x18] sm:$0xff]  ;;  %vm109_vm1 = vcmask 261120   ;;  %s179_s1 = smov [#allocation2]  }
   0x6   :  { %v21_v8 = vpack.c.bf16 %v19_v7, %v18_v6  ;;  %v130_v9 = vld [vmem:[%s231_s2] ss:$0 sm:$0xff]  ;;  %s119_s28 = sshll.u32 %s179_s1, 4  ;;  %s120_s28 = int_to_ptr.vmem [resolvable:$true] %s119_s28 }
   0x7   :  { %144 = vmatpush3.bf16.msra.mxu0 %v155_v1  ;;  %s157_s0 = scalar_lea.vmem %s120_s28, 512  ;;  %p162_p1 = scmp.lt.s32.totalorder %s120_s28, %s120_s28 }
   0x8   :  { %145 = vmatprep.subr.bf16.mxu0 %v156_v4  ;;  %p158_p0 = scmp.ne.s32.totalorder %s120_s28, %s157_s0  ;;  %p163_p2 = scmp.lt.s32.totalorder %s157_s0, %s157_s0 }
   0xa   :  { %p164_p3 = por %p163_p2, %p162_p1 }
   0xb   :  { %146 = vmatpush3.bf16.msra.mxu0 %v156_v4 }
   0xc   :  { %p165_p4 = pnand %p164_p3, %p158_p0 }
   0xe   :  { %148 = vmatmul.mubr.msk.bf16.vlgmr.msra.gmra.mxu0 %vm53_vm0, %v21_v8 }
  0xce   :  { %v149_v10 = vpop.f32.mrf.mxu0 }
  0xcf   :  { %v103_v11 = vadd.f32 %v149_v10, %v130_v9 }
  0xd0   :  { %v94_v12 = vpop.f32.mrf.mxu0 }
  0xd1   :  { %112 = vst.msk [vmem:[#allocation2 + $0x10] sm:$0xff] %vm109_vm1, %v103_v11  ;;  %v95_v13 = vadd.f32 %v130_v9, %v94_v12 }
  0xd2   :  { %v150_v14 = vpop.f32.mrf.mxu0 }
  0xd3   :  { %110 = vst.msk [vmem:[#allocation2] sm:$0xff] %vm109_vm1, %v95_v13  ;;  %v106_v15 = vadd.f32 %v150_v14, %v130_v9 }
  0xd4   :  { %v97_v16 = vpop.f32.mrf.mxu0 }
  0xd5   :  { %113 = vst.msk [vmem:[#allocation2 + $0x18] sm:$0xff] %vm109_vm1, %v106_v15  ;;  %v98_v17 = vadd.f32 %v130_v9, %v97_v16 }
  0xd7   :  { %111 = vst.msk [vmem:[#allocation2 + $0x8] sm:$0xff] %vm109_vm1, %v98_v17 }
  0xd8   :  { %168 = shalt.err (!%p165_p4)
}
  0xd9   :  { %s180_s2 = smov 128   ;;  %s181_s29 = smov 8  }
  0xda   :  { %125 = dma.vmem_to_hbm [thread:$0]  %s120_s28, 512, %s232_s3, [#allocation3], %s180_s2, %s180_s2, %s181_s29  }
  0xdb   :  { %177 = dma.done.wait [#allocation3], 512  }
  0xdc   :  { %178 = vsyncadd [#allocation3], 4294966784 }
  0xdd   :  { %129 = vsyncpa [#allocation3], 1 }

</bundles_post_ra>
